<compile_context>
chip_gen: v7x
topology: tpu7x:2x2x1
jax: 0.10.0
libtpu: 0.0.40
codegen_flags: <defaults>
</compile_context>

<pallas_src>
import jax
import jax.numpy as jnp
from jax.experimental import pallas as pl
from jax.experimental.pallas import tpu as pltpu


_INV_SQRT2 = 0.7071067811865476  # 1/sqrt(2), for exact (erf) GELU
_LN_EPS = 1e-5                   # PyTorch nn.LayerNorm default


def _projection_head_kernel(z_ref, w1_ref, w2_ref, params_ref, out_ref, proj_ref):
    """One tile of rows: full projection-head forward on the MXU/VPU/EUP."""
    params = params_ref[...]          # (4, P) f32: b1, b2, gamma, beta
    b1 = params[0:1, :]
    b2 = params[1:2, :]
    gamma = params[2:3, :]
    beta = params[3:4, :]

    # projection = z @ W1 + b1  (MXU in operand dtype, f32 accumulation).
    proj = jnp.dot(z_ref[...], w1_ref[...], preferred_element_type=jnp.float32)
    proj = proj + b1
    # Keep the residual in VMEM scratch so it does not live in vregs across the
    # second matmul (avoids invisible vreg-spill traffic for large row tiles).
    proj_ref[...] = proj

    # Exact GELU (matches torch.nn.GELU default): 0.5*x*(1+erf(x/sqrt(2))).
    h = 0.5 * proj * (1.0 + jax.lax.erf(proj * _INV_SQRT2))

    # fc = gelu(proj) @ W2 + b2  (cast activations to MXU dtype, f32 accumulate).
    h = jnp.dot(h.astype(w2_ref.dtype), w2_ref[...],
                preferred_element_type=jnp.float32)
    h = h + b2

    # TODO(synk): Dropout is identity here (eval mode); training-mode dropout
    # would need pltpu.prng_seed + pltpu.prng_random_bits masking.

    # Residual add.
    h = h + proj_ref[...]

    # LayerNorm over the last dim (proj_dim).
    mean = jnp.mean(h, axis=-1, keepdims=True)
    centered = h - mean
    var = jnp.mean(centered * centered, axis=-1, keepdims=True)
    normed = centered * jax.lax.rsqrt(var + _LN_EPS)
    out_ref[...] = (normed * gamma + beta).astype(out_ref.dtype)


def _round_up(x, m):
    return (x + m - 1) // m * m


def _vmem_budget_bytes():
    """Generation-aware VMEM budget: ~75% of physical capacity.

    v7x: ~48 MiB of 64 MiB; v5e/v6e: ~96 MiB of 128 MiB.  Conservative
    fallback (assume the smallest, v7x) if the hardware query is unavailable.
    """
    try:
        cap = int(pltpu.get_tpu_info().vmem_capacity_bytes)
    except Exception:
        cap = 64 * 2**20
    return int(0.75 * cap)


def projection_head(z, w1, b1, w2, b2, gamma, beta, *,
                    block_rows=512, compute_dtype=None):
    """ProjectionHead forward: z (B, embedding_dim) -> (B, proj_dim).

    compute_dtype: optional MXU-operand dtype (e.g. jnp.bfloat16) for z/W1/W2
    (recommended on v6e/v7x).  Accumulation, biases and LayerNorm stay f32.
    Returns a lazy device array (no host sync) so the call is jit-composable.
    """
    out_dtype = z.dtype
    B, E = z.shape
    E2, P = w1.shape
    assert E == E2 and w2.shape == (P, P)

    if compute_dtype is not None:
        z = z.astype(compute_dtype)
        w1 = w1.astype(compute_dtype)
        w2 = w2.astype(compute_dtype)

    # b1 / b2 / LN gamma / LN beta packed into a single (4, P) f32 operand:
    # one grid-invariant DMA + one padded VMEM tile instead of four.
    params = jnp.stack([
        jnp.asarray(b1, jnp.float32).reshape(P),
        jnp.asarray(b2, jnp.float32).reshape(P),
        jnp.asarray(gamma, jnp.float32).reshape(P),
        jnp.asarray(beta, jnp.float32).reshape(P),
    ], axis=0)

    in_itemsize = jnp.dtype(z.dtype).itemsize
    out_itemsize = jnp.dtype(out_dtype).itemsize
    # Sublane packing granule: f32 -> 8 rows, bf16 -> 16, int8/fp8 -> 32.
    row_align = 8 * (4 // in_itemsize)

    # --- Row-tile sizing --------------------------------------------------
    # VMEM cap: resident double-buffered weights/params plus per-row cost of
    # the (double-buffered) z tile, out tile and the f32 residual scratch.
    budget = _vmem_budget_bytes()
    weight_resident = 2 * ((E * P + P * P) * in_itemsize + params.size * 4)
    per_row = 2 * E * in_itemsize + 2 * P * out_itemsize + P * 4
    rows_by_vmem = (budget - weight_resident) // per_row
    # TODO(synk): for very large proj_dim the fully-resident W1/W2 may exceed
    # the budget (esp. v7x 64 MiB); that regime needs an output-P tiling axis.
    rows_by_vmem = max(row_align, (rows_by_vmem // row_align) * row_align)

    target = min(block_rows, rows_by_vmem, _round_up(B, row_align))
    # Ensure >= 2 grid steps when the batch permits so the "parallel" grid
    # axis can split across both v7x TensorCores (neutral on v5e/v6e).
    if B >= 2 * row_align:
        target = min(target, _round_up(pl.cdiv(B, 2), row_align))
    block_rows = _round_up(max(row_align, target), row_align)
    # Uneven last block: handled by Pallas masked partial blocks.  Garbage rows
    # in the padded tile only affect themselves (all ops are per-row) and are
    # never written back to HBM.
    grid_rows = pl.cdiv(B, block_rows)

    # Advisory cost estimate for XLA's scheduler.
    cost = pl.CostEstimate(
        flops=2 * B * P * (E + P),
        transcendentals=B * P,  # GELU nonlinearity (advisory only)
        bytes_accessed=(B * E + E * P + P * P) * in_itemsize
        + params.size * 4
        + B * P * out_itemsize,
    )

    grid_spec = pltpu.PrefetchScalarGridSpec(
        num_scalar_prefetch=0,
        grid=(grid_rows,),
        in_specs=[
            pl.BlockSpec((block_rows, E), lambda i: (i, 0)),  # z row tile
            pl.BlockSpec((E, P), lambda i: (0, 0)),           # W1 (grid-invariant)
            pl.BlockSpec((P, P), lambda i: (0, 0)),           # W2 (grid-invariant)
            pl.BlockSpec((4, P), lambda i: (0, 0)),           # b1/b2/gamma/beta
        ],
        out_specs=pl.BlockSpec((block_rows, P), lambda i: (i, 0)),
        scratch_shapes=[pltpu.VMEM((block_rows, P), jnp.float32)],  # residual
    )

    return pl.pallas_call(
        _projection_head_kernel,
        out_shape=jax.ShapeDtypeStruct((B, P), out_dtype),
        grid_spec=grid_spec,
        compiler_params=pltpu.CompilerParams(
            dimension_semantics=("parallel",),
            vmem_limit_bytes=budget),
        cost_estimate=cost,
    )(z, w1, w2, params)


def projection_head_reference(z, w1, b1, w2, b2, gamma, beta):
    """Pure-JAX reference matching the PyTorch module (eval mode)."""
    z = z.astype(jnp.float32)
    proj = z @ w1 + b1
    h = 0.5 * proj * (1.0 + jax.lax.erf(proj / jnp.sqrt(2.0)))
    h = h @ w2 + b2
    h = h + proj
    mean = jnp.mean(h, axis=-1, keepdims=True)
    var = jnp.mean((h - mean) ** 2, axis=-1, keepdims=True)
    h = (h - mean) * jax.lax.rsqrt(var + _LN_EPS)
    return h * gamma + beta


if __name__ == "__main__":
    # Small shapes consistent with the module: batch of embeddings z of size
    # embedding_dim, projected to proj_embedding_dim.
    batch = 16
    embedding_dim = 32
    proj_dim = 128  # args.proj_embedding_dim

    key = jax.random.PRNGKey(0)
    kz, k1, kb1, k2, kb2 = jax.random.split(key, 5)

    z = jax.random.normal(kz, (batch, embedding_dim), dtype=jnp.float32)

    # Deterministic synthetic parameters (shapes match nn.Linear/nn.LayerNorm).
    # nn.Linear weight is (out, in) in PyTorch; we store its transpose (in, out).
    w1 = jax.random.normal(k1, (embedding_dim, proj_dim), jnp.float32) * (embedding_dim ** -0.5)
    b1 = jax.random.normal(kb1, (proj_dim,), jnp.float32) * 0.01
    w2 = jax.random.normal(k2, (proj_dim, proj_dim), jnp.float32) * (proj_dim ** -0.5)
    b2 = jax.random.normal(kb2, (proj_dim,), jnp.float32) * 0.01
    gamma = jnp.ones((proj_dim,), jnp.float32)   # LayerNorm weight
    beta = jnp.zeros((proj_dim,), jnp.float32)   # LayerNorm bias

    ref = projection_head_reference(z, w1, b1, w2, b2, gamma, beta)

    # f32 path (also exercises a multi-step parallel grid for megacore split).
    out_f32 = jax.block_until_ready(
        projection_head(z, w1, b1, w2, b2, gamma, beta))
    assert out_f32.shape == (batch, proj_dim)
    assert jnp.allclose(out_f32, ref, atol=1e-4, rtol=1e-4), "f32 mismatch vs reference"

    # bf16 MXU-operand path (f32 accumulation): looser tolerance.
    out_bf16 = jax.block_until_ready(
        projection_head(z, w1, b1, w2, b2, gamma, beta, compute_dtype=jnp.bfloat16))
    assert out_bf16.shape == (batch, proj_dim)
    assert jnp.allclose(out_bf16, ref, atol=1e-1, rtol=5e-2), "bf16 mismatch vs reference"

    # Non-divisible batch exercises the masked partial-block path (no jnp.pad).
    z_odd = jax.random.normal(jax.random.PRNGKey(1), (13, embedding_dim), jnp.float32)
    out_odd = jax.block_until_ready(
        projection_head(z_odd, w1, b1, w2, b2, gamma, beta))
    ref_odd = projection_head_reference(z_odd, w1, b1, w2, b2, gamma, beta)
    assert out_odd.shape == (13, proj_dim)
    assert jnp.allclose(out_odd, ref_odd, atol=1e-4, rtol=1e-4), "remainder-path mismatch"

    print("KERNEL_OK")
</pallas_src>

<mosaic_0001>
module attributes {stable_mosaic.version = 11 : i64} {
  func.func @_projection_head_kernel(%arg0: i32, %arg1: memref<8x32xf32, #tpu.memory_space<vmem>>, %arg2: memref<32x128xf32, #tpu.memory_space<vmem>>, %arg3: memref<128x128xf32, #tpu.memory_space<vmem>>, %arg4: memref<4x128xf32, #tpu.memory_space<vmem>>, %arg5: memref<8x128xf32, #tpu.memory_space<vmem>>, %arg6: memref<8x128xf32, #tpu.memory_space<vmem>>) attributes {dimension_semantics = [#tpu.dimension_semantics<parallel>], iteration_bounds = array<i64: 2>, scalar_prefetch = 0 : i64, scratch_operands = 1 : i64, tpu.core_type = #tpu.core_type<tc>, window_params = [{transform_indices = @transform_0, window_bounds = array<i64: 8, 32>}, {pipeline_mode = #tpu.pipeline_mode<synchronous>, transform_indices = @transform_1, window_bounds = array<i64: 32, 128>}, {pipeline_mode = #tpu.pipeline_mode<synchronous>, transform_indices = @transform_2, window_bounds = array<i64: 128, 128>}, {pipeline_mode = #tpu.pipeline_mode<synchronous>, transform_indices = @transform_3, window_bounds = array<i64: 4, 128>}, {transform_indices = @transform_4, window_bounds = array<i64: 8, 128>}]} {
    %c0 = arith.constant 0 : index
    %c0_0 = arith.constant 0 : index
    %0 = vector.load %arg4[%c0, %c0_0] : memref<4x128xf32, #tpu.memory_space<vmem>>, vector<4x128xf32>
    %1 = vector.extract_strided_slice %0 {offsets = [0, 0], sizes = [1, 128], strides = [1, 1]} : vector<4x128xf32> to vector<1x128xf32>
    %2 = vector.extract_strided_slice %0 {offsets = [1, 0], sizes = [1, 128], strides = [1, 1]} : vector<4x128xf32> to vector<1x128xf32>
    %3 = vector.extract_strided_slice %0 {offsets = [2, 0], sizes = [1, 128], strides = [1, 1]} : vector<4x128xf32> to vector<1x128xf32>
    %4 = vector.extract_strided_slice %0 {offsets = [3, 0], sizes = [1, 128], strides = [1, 1]} : vector<4x128xf32> to vector<1x128xf32>
    %c0_1 = arith.constant 0 : index
    %c0_2 = arith.constant 0 : index
    %5 = vector.load %arg1[%c0_1, %c0_2] : memref<8x32xf32, #tpu.memory_space<vmem>>, vector<8x32xf32>
    %c0_3 = arith.constant 0 : index
    %c0_4 = arith.constant 0 : index
    %6 = vector.load %arg2[%c0_3, %c0_4] : memref<32x128xf32, #tpu.memory_space<vmem>>, vector<32x128xf32>
    %cst = arith.constant dense<0.000000e+00> : vector<8x128xf32>
    %7 = tpu.matmul %5, %6, %cst {dimension_numbers = #tpu.dot_dimension_numbers<[1], [0], [0], [1], [0, 0, 1, 1], [], []>} : vector<8x32xf32>, vector<32x128xf32>, vector<8x128xf32> -> vector<8x128xf32>
    %8 = vector.broadcast %1 : vector<1x128xf32> to vector<8x128xf32>
    %9 = arith.addf %7, %8 : vector<8x128xf32>
    %c0_5 = arith.constant 0 : index
    %c0_6 = arith.constant 0 : index
    %10 = vector.load %arg6[%c0_5, %c0_6] : memref<8x128xf32, #tpu.memory_space<vmem>>, vector<8x128xf32>
    tpu.vector_store %arg6[%c0_5, %c0_6], %9 {strides = array<i32>} : memref<8x128xf32, #tpu.memory_space<vmem>>, vector<8x128xf32>,
    %cst_7 = arith.constant 5.000000e-01 : f32
    %11 = vector.broadcast %cst_7 : f32 to vector<8x128xf32>
    %12 = arith.mulf %11, %9 : vector<8x128xf32>
    %cst_8 = arith.constant 0.707106769 : f32
    %13 = vector.broadcast %cst_8 : f32 to vector<8x128xf32>
    %14 = arith.mulf %9, %13 : vector<8x128xf32>
    %15 = math.erf %14 : vector<8x128xf32>
    %cst_9 = arith.constant 1.000000e+00 : f32
    %16 = vector.broadcast %cst_9 : f32 to vector<8x128xf32>
    %17 = arith.addf %16, %15 : vector<8x128xf32>
    %18 = arith.mulf %12, %17 : vector<8x128xf32>
    %c0_10 = arith.constant 0 : index
    %c0_11 = arith.constant 0 : index
    %19 = vector.load %arg3[%c0_10, %c0_11] : memref<128x128xf32, #tpu.memory_space<vmem>>, vector<128x128xf32>
    %cst_12 = arith.constant dense<0.000000e+00> : vector<8x128xf32>
    %20 = tpu.matmul %18, %19, %cst_12 {dimension_numbers = #tpu.dot_dimension_numbers<[1], [0], [0], [1], [0, 0, 1, 1], [], []>} : vector<8x128xf32>, vector<128x128xf32>, vector<8x128xf32> -> vector<8x128xf32>
    %21 = vector.broadcast %2 : vector<1x128xf32> to vector<8x128xf32>
    %22 = arith.addf %20, %21 : vector<8x128xf32>
    %c0_13 = arith.constant 0 : index
    %c0_14 = arith.constant 0 : index
    %23 = vector.load %arg6[%c0_13, %c0_14] : memref<8x128xf32, #tpu.memory_space<vmem>>, vector<8x128xf32>
    %24 = arith.addf %22, %23 : vector<8x128xf32>
    %cst_15 = arith.constant dense<0.000000e+00> : vector<8xf32>
    %25 = vector.multi_reduction <add>, %24, %cst_15 [1] : vector<8x128xf32> to vector<8xf32>
    %26 = vector.shape_cast %25 : vector<8xf32> to vector<8x1xf32>
    %cst_16 = arith.constant 1.280000e+02 : f32
    %27 = vector.broadcast %cst_16 : f32 to vector<8x1xf32>
    %28 = arith.divf %26, %27 : vector<8x1xf32>
    %29 = vector.broadcast %28 : vector<8x1xf32> to vector<8x128xf32>
    %30 = arith.subf %24, %29 : vector<8x128xf32>
    %31 = arith.mulf %30, %30 : vector<8x128xf32>
    %cst_17 = arith.constant dense<0.000000e+00> : vector<8xf32>
    %32 = vector.multi_reduction <add>, %31, %cst_17 [1] : vector<8x128xf32> to vector<8xf32>
    %33 = vector.shape_cast %32 : vector<8xf32> to vector<8x1xf32>
    %cst_18 = arith.constant 1.280000e+02 : f32
    %34 = vector.broadcast %cst_18 : f32 to vector<8x1xf32>
    %35 = arith.divf %33, %34 : vector<8x1xf32>
    %cst_19 = arith.constant 9.99999974E-6 : f32
    %36 = vector.broadcast %cst_19 : f32 to vector<8x1xf32>
    %37 = arith.addf %35, %36 : vector<8x1xf32>
    %38 = math.rsqrt %37 : vector<8x1xf32>
    %39 = vector.broadcast %38 : vector<8x1xf32> to vector<8x128xf32>
    %40 = arith.mulf %30, %39 : vector<8x128xf32>
    %41 = vector.broadcast %3 : vector<1x128xf32> to vector<8x128xf32>
    %42 = arith.mulf %40, %41 : vector<8x128xf32>
    %43 = vector.broadcast %4 : vector<1x128xf32> to vector<8x128xf32>
    %44 = arith.addf %42, %43 : vector<8x128xf32>
    %c0_20 = arith.constant 0 : index
    %c0_21 = arith.constant 0 : index
    %45 = vector.load %arg5[%c0_20, %c0_21] : memref<8x128xf32, #tpu.memory_space<vmem>>, vector<8x128xf32>
    tpu.vector_store %arg5[%c0_20, %c0_21], %44 {strides = array<i32>} : memref<8x128xf32, #tpu.memory_space<vmem>>, vector<8x128xf32>,
    return
  }
  func.func @transform_0(%arg0: i32) -> (i32, i32) {
    %c0_i32 = arith.constant 0 : i32
    %c0_i32_0 = arith.constant 0 : i32
    return %arg0, %c0_i32 : i32, i32
  }
  func.func @transform_1(%arg0: i32) -> (i32, i32) {
    %c0_i32 = arith.constant 0 : i32
    %c0_i32_0 = arith.constant 0 : i32
    %c0_i32_1 = arith.constant 0 : i32
    return %c0_i32, %c0_i32_0 : i32, i32
  }
  func.func @transform_2(%arg0: i32) -> (i32, i32) {
    %c0_i32 = arith.constant 0 : i32
    %c0_i32_0 = arith.constant 0 : i32
    %c0_i32_1 = arith.constant 0 : i32
    return %c0_i32, %c0_i32_0 : i32, i32
  }
  func.func @transform_3(%arg0: i32) -> (i32, i32) {
    %c0_i32 = arith.constant 0 : i32
    %c0_i32_0 = arith.constant 0 : i32
    %c0_i32_1 = arith.constant 0 : i32
    return %c0_i32, %c0_i32_0 : i32, i32
  }
  func.func @transform_4(%arg0: i32) -> (i32, i32) {
    %c0_i32 = arith.constant 0 : i32
    %c0_i32_0 = arith.constant 0 : i32
    return %arg0, %c0_i32 : i32, i32
  }
}

</mosaic_0001>

<bundles_post_ra>
// kernel: tpu_custom_call.1
= control target key start
LH: loop header
LB: loop body
LE: loop exit
PB: predicated region body
PF: predicated region fallthrough
CT: control target
= control target key end

     0   :  { %9 = vsyncpa [#allocation4], 0  ;;  %s1172_s0 = inlined_call_operand.hbm [shape: f32[16,32], index: 0, kind: input, shape index: {}]   ;;  %s1173_s1 = inlined_call_operand.hbm [shape: f32[32,128], index: 1, kind: input, shape index: {}]   ;;  %s1174_s2 = inlined_call_operand.hbm [shape: f32[128,128], index: 2, kind: input, shape index: {}]   ;;  %s1175_s3 = inlined_call_operand.vmem [shape: f32[4,128], index: 3, kind: input, shape index: {}]   ;;  %s1176_s4 = inlined_call_operand.hbm [shape: f32[16,128], index: 4, kind: output, shape index: {}]  }
   0x1   :  { %11 = vsyncpa [#allocation4 + $0x1], 0 }
   0x2   :  { %12 = vsyncpa [#allocation7], 0 }
   0x3   :  { %13 = vsyncpa [#allocation5], 0 }
   0x4   :  { %15 = vsyncpa [#allocation5 + $0x1], 0  ;;  %s933_s15 = smov 0   ;;  %s935_s16 = smov 0  }
   0x5   :  { %s937_s17 = smov 0   ;;  %s939_s18 = smov 0  }
   0x6 LB: > { %s954_s19 = sadd.s32 4294967295, %s897_s18   ;;  %s550_s20 = sadd.s32 4294967294, %s897_s18   ;;  %s897_s18 = sphi %s939_s18, %s1196_s18   ;;  %s893_s17 = sphi %s937_s17, %s1195_s17   ;;  %s889_s16 = sphi %s935_s16, %s1194_s16   ;;  %s885_s15 = sphi %s933_s15, %s1193_s15  }
   0x7   : > { %p41_p0 = scmp.ne.s32.totalorder %s889_s16, %s885_s15  ;;  %p1177_p1 = scmp.eq.s32.totalorder %s954_s19, 0 }
   0x8   : > { %p134_p3 = scmp.eq.s32.totalorder %s550_s20, 1  ;;  %p551_p5 = scmp.ge.s32.totalorder %s897_s18, 1 }
   0x9   : > { %p963_p4 = por %p1177_p1, %p41_p0  ;;  %p141_p7 = scmp.lt.s32.totalorder %s897_s18, 3 }
   0xa   : > { %p968_p6 = por %p134_p3, %p41_p0  ;;  %s899_s24 = smov [#allocation6]  }
   0xb   : > { %s1180_s21 = scalar_select %p963_p4, 1, 0 }
   0xc   : > { %s1181_s22 = scalar_select %p968_p6, 1, 0 }
   0xd   : > { %p973_p8 = pnand %p551_p5, %p141_p7  ;;  %s153_s25 = sshll.u32 %s899_s24, 4  ;;  %s977_s25 = int_to_ptr.vmem [resolvable:$true] %s153_s25 }
   0xe   : > { %s900_s27 = smov [#allocation8]   ;;  %s741_s5 = scalar_lea.hbm %s1173_s1, 512 }
   0xf   : > { %p677_p9 = pneg %p973_p8  ;;  %s166_s28 = sshll.u32 %s900_s27, 4  ;;  %s988_s28 = int_to_ptr.vmem [resolvable:$true] %s166_s28 }
  0x10   : > { %p742_p12 = scmp.ne.s32.totalorder %s1173_s1, %s741_s5  ;;  %p748_p5 = scmp.lt.u32.totalorder %s741_s5, %s1173_s1 }
  0x11   : > { %p984_p11 = pnand %p677_p9, %p1177_p1 }
  0x13   : > { %p743_p13 = pneg %p984_p11 }
  0x15   : > { %p744_p0 = pnand %p743_p13, %p742_p12 }
  0x17   : > { %p745_p3 = pneg %p744_p0 }
  0x19   : > { %p750_p7 = pnand %p748_p5, %p745_p3 }
  0x1b   : > { %753 = shalt.err (!%p750_p7)
}
  0x1c   : > { %s754_s10 = scalar_lea.vmem %s977_s25, 512  ;;  %p762_p2 = scmp.lt.s32.totalorder %s977_s25, %s977_s25 }
  0x1d   : > { %p755_p9 = scmp.ne.s32.totalorder %s977_s25, %s754_s10  ;;  %p763_p12 = scmp.lt.s32.totalorder %s754_s10, %s754_s10 }
  0x1f   : > { %p757_p10 = pnand %p755_p9, %p743_p13  ;;  %p764_p0 = por %p763_p12, %p762_p2 }
  0x21   : > { %p758_p1 = pneg %p757_p10 }
  0x23   : > { %p765_p6 = pnand %p764_p0, %p758_p1 }
  0x25   : > { %768 = shalt.err (!%p765_p6)
}
  0x26   : > { %s901_s11 = smov 128   ;;  %s902_s12 = smov 8  }
  0x27   : > { %680 = dma.hbm_to_vmem [thread:$0]  (!%p984_p11), %s1173_s1, 512, %s977_s25, [#allocation7], %s901_s11, %s901_s11, %s902_s12  }
  0x28   : > { %s769_s27 = scalar_lea.hbm %s1174_s2, 2048 }
  0x29   : > { %p770_p2 = scmp.ne.s32.totalorder %s1174_s2, %s769_s27  ;;  %p776_p10 = scmp.lt.u32.totalorder %s769_s27, %s1174_s2 }
  0x2b   : > { %p772_p1 = pnand %p770_p2, %p743_p13 }
  0x2d   : > { %p773_p6 = pneg %p772_p1 }
  0x2f   : > { %p778_p3 = pnand %p776_p10, %p773_p6 }
  0x31   : > { %781 = shalt.err (!%p778_p3)
}
  0x32   : > { %s782_s25 = scalar_lea.vmem %s988_s28, 2048  ;;  %p790_p12 = scmp.lt.s32.totalorder %s988_s28, %s988_s28 }
  0x33   : > { %p783_p5 = scmp.ne.s32.totalorder %s988_s28, %s782_s25  ;;  %p791_p0 = scmp.lt.s32.totalorder %s782_s25, %s782_s25 }
  0x35   : > { %p785_p7 = pnand %p783_p5, %p743_p13  ;;  %p792_p2 = por %p791_p0, %p790_p12 }
  0x37   : > { %p786_p9 = pneg %p785_p7 }
  0x39   : > { %p793_p1 = pnand %p792_p2, %p786_p9 }
  0x3b   : > { %796 = shalt.err (!%p793_p1)
}
  0x3c   : > { %683 = dma.hbm_to_vmem [thread:$0]  (!%p984_p11), %s1174_s2, 2048, %s988_s28, [#allocation7], %s901_s11, %s901_s11, %s902_s12  }
  0x3d   : > { %s1043_s9 = sadd.s32 1, %s897_s18   ;;  %s28_s26 = sadd.s32 1, %s893_s17 }
  0x3e   : > { %s25_s10 = ssub.s32 %s897_s18, %s1043_s9  ;;  %p35_p13 = scmp.ne.s32.totalorder %s893_s17, %s889_s16 }
  0x3f   : > { %p26_p6 = scmp.eq.s32.totalorder %s25_s10, 0  ;;  %p36_p10 = scmp.eq.s32.totalorder %s897_s18, 0 }
  0x40   : > { %p1184_p3 = scmp.eq.s32.totalorder %s954_s19, 1  ;;  %p694_p7 = scmp.lt.s32.totalorder %s897_s18, 2 }
  0x41   : > { %s1059_s14 = scalar_select %p26_p6, %s893_s17, %s28_s26  }
  0x42   : > { %p1053_p5 = por %p1184_p3, %p35_p13  ;;  %p37_p9 = por %p36_p10, %p35_p13 }
  0x43   : > { %s183_s20 = sand.u32 1, %s893_s17   ;;  %s556_s28 = sshll.u32 %s897_s18, 7 }
  0x44   : > { %s1185_s13 = scalar_select %p1053_p5, 1, 0 }
  0x45   : > { %s555_s24 = sshll.u32 %s183_s20, 3  ;;  %s1066_s27 = scalar_lea.hbm %s1172_s0, %s556_s28 }
  0x46   : > { %s187_s29 = scalar_lea.vmem [#allocation3], %s555_s24  ;;  %p1070_p11 = pnand %p694_p7, %p37_p9 }
  0x47   : > { %s194_s30 = sshll.u32 %s187_s29, 4  ;;  %s184_s6 = scalar_lea.sflag [#allocation4], %s183_s20  ;;  %s1068_s30 = int_to_ptr.vmem [resolvable:$true] %s194_s30 }
  0x48   : > { %s797_s25 = scalar_lea.hbm %s1066_s27, 128  ;;  %p799_p0 = pneg %p1070_p11 }
  0x49   : > { %p798_p12 = scmp.ne.s32.totalorder %s1066_s27, %s797_s25  ;;  %s802_s26 = scalar_lea.hbm %s1172_s0, 256 }
  0x4a   : > { %p803_p13 = scmp.lt.u32.totalorder %s1066_s27, %s1172_s0  ;;  %p804_p6 = scmp.lt.u32.totalorder %s802_s26, %s797_s25 }
  0x4b   : > { %p800_p2 = pnand %p799_p0, %p798_p12  ;;  %p806_p3 = scmp.lt.u32.totalorder %s797_s25, %s1066_s27 }
  0x4c   : > { %p805_p10 = por %p804_p6, %p803_p13 }
  0x4d   : > { %p801_p1 = pneg %p800_p2 }
  0x4e   : > { %p807_p7 = por %p806_p3, %p805_p10 }
  0x50   : > { %p808_p9 = pnand %p807_p7, %p801_p1 }
  0x52   : > { %811 = shalt.err (!%p808_p9)
}
  0x53   : > { %s812_s20 = scalar_lea.vmem %s1068_s30, 128  ;;  %s903_s28 = smov [#allocation3]  }
  0x54   : > { %p813_p12 = scmp.ne.s32.totalorder %s1068_s30, %s812_s20  ;;  %s817_s11 = sshll.u32 %s903_s28, 4  ;;  %s818_s11 = int_to_ptr.vmem [resolvable:$false] %s817_s11 }
  0x55   : > { %s819_s12 = scalar_lea.vmem %s818_s11, 256  ;;  %p820_p4 = scmp.lt.s32.totalorder %s1068_s30, %s818_s11 }
  0x56   : > { %p815_p2 = pnand %p813_p12, %p799_p0  ;;  %p821_p13 = scmp.lt.s32.totalorder %s819_s12, %s812_s20 }
  0x58   : > { %p816_p5 = pneg %p815_p2  ;;  %p822_p6 = por %p821_p13, %p820_p4 }
  0x5a   : > { %p823_p10 = pnand %p822_p6, %p816_p5 }
  0x5c   : > { %826 = shalt.err (!%p823_p10)
}
  0x5d   : > { %687 = dma.hbm_to_vmem [thread:$0]  (!%p1070_p11), %s1066_s27, 128, %s1068_s30, %s184_s6  }
  0x5e   : > { %203 = sbr.rel (%p973_p8) target bundleno = 887 (0x377), region = 36  ;;  %s1102_s29 = sand.u32 (!%p973_p8), 1, %s889_s16  }
  0x5f   : > { %s558_s25 = sshll.u32 (!%p973_p8), %s1102_s29, 3  ;;  %s206_s7 = scalar_lea.sflag (!%p973_p8), [#allocation4], %s1102_s29 }
  0x60   : > { %s1108_s8 = scalar_lea.vmem (!%p973_p8), [#allocation3], %s558_s25  ;;  %p1187_p4 = scmp.ne.s32.totalorder (!%p973_p8), %s1180_s21, 0 }
  0x65   : > { %872 = dma.done.wait (%p1187_p4), %s206_s7, 128  }
  0x66   : > { %874 = vsyncadd (%p1187_p4), %s206_s7, 4294967168  ;;  %p1188_p5 = scmp.eq.s32.totalorder %s954_s19, 0 }
  0x68   : > { %876 = dma.done.wait (%p1188_p5), [#allocation7], 2560   ;;  %p1189_p8 = pmov %p1188_p5 }
  0x69   : > { %v904_v0 = vmov 0.0|0.0   ;;  %vm905_vm0 = vmmov 0   ;;  %v906_v1 = vmov 0.0   ;;  %v244_v2 = vld [vmem:[#allocation6] sm:$0xff]  ;;  %v245_v3 = vld [vmem:[#allocation6 + $0x8] sm:$0xff]  ;;  %v246_v4 = vld [vmem:[#allocation6 + $0x10] sm:$0xff]  ;;  %v248_v33 = vlaneseq }
  0x6a   : > { %878 = vsyncadd (%p1189_p8), [#allocation7], 4294964736  ;;  %635 = vmatprep.subr.bf16.mxu0 %v904_v0  ;;  %597 = vmatprep.mubr.msk.f32.mxu0 %vm905_vm0, %v906_v1  ;;  %v636_v5 = vpack.c.bf16 %v245_v3, %v244_v2  ;;  %v247_v6 = vld [vmem:[#allocation6 + $0x18] sm:$0xff]  ;;  %v332_v7 = vld [vmem:[#allocation8] sm:$0xff]  ;;  %vm252_vm1 = vcmask 261120   ;;  %s564_s27 = sshll.u32 %s954_s19, 7 }
  0x6b   : > { %641 = vmatprep.subr.bf16.mxu1 %v904_v0  ;;  %632 = vmatprep.mubr.msk.f32.mxu1 %vm905_vm0, %v906_v1  ;;  %v333_v8 = vld [vmem:[#allocation8 + $0x8] sm:$0xff]  ;;  %v334_v9 = vld [vmem:[#allocation8 + $0x10] sm:$0xff]  ;;  %v335_v10 = vld [vmem:[#allocation8 + $0x18] sm:$0xff]  ;;  %v639_v11 = vpack.c.bf16 %v247_v6, %v246_v4  ;;  %v249_v34 = vshrl.u32 %v248_v33, 7  ;;  %s241_s30 = scalar_lea.vmem [#allocation9], %s558_s25  ;;  %s1128_s10 = scalar_lea.hbm %s1176_s4, %s564_s27 }
  0x6c   : > { %637 = vmatpush3.bf16.msra.mxu0 %v636_v5  ;;  %v642_v12 = vpack.c.bf16 %v333_v8, %v332_v7  ;;  %v645_v13 = vpack.c.bf16 %v335_v10, %v334_v9  ;;  %v336_v14 = vld [vmem:[#allocation8 + $0x20] sm:$0xff]  ;;  %v337_v15 = vld [vmem:[#allocation8 + $0x28] sm:$0xff]  ;;  %v243_v16 = vld [vmem:[%s1108_s8] sm:$0xff]  ;;  %s461_s5 = sshll.u32 %s241_s30, 4  ;;  %s448_s24 = scalar_lea.sflag [#allocation5], %s1102_s29  ;;  %s1130_s5 = int_to_ptr.vmem [resolvable:$true] %s461_s5 }
  0x6d   : > { %638 = vmatprep.subr.bf16.mxu0 %v904_v0  ;;  %v648_v17 = vpack.c.bf16 %v337_v15, %v336_v14  ;;  %v338_v18 = vld [vmem:[#allocation8 + $0x30] sm:$0xff]  ;;  %v339_v19 = vld [vmem:[#allocation8 + $0x38] sm:$0xff]  ;;  %v340_v21 = vld [vmem:[#allocation8 + $0x40] sm:$0xff]  ;;  %v250_v35 = vsub.s32 0, %v249_v34  ;;  %v350_v46 = vsub.s32 1, %v249_v34  ;;  %v438_v59 = vsub.s32 2, %v249_v34 }
  0x6e   : > { %643 = vmatpush3.bf16.msra.mxu1 %v642_v12  ;;  %v651_v20 = vpack.c.bf16 %v339_v19, %v338_v18  ;;  %v341_v22 = vld [vmem:[#allocation8 + $0x48] sm:$0xff]  ;;  %v342_v24 = vld [vmem:[#allocation8 + $0x50] sm:$0xff]  ;;  %v343_v25 = vld [vmem:[#allocation8 + $0x58] sm:$0xff]  ;;  %v443_v60 = vsub.s32 3, %v249_v34  ;;  %s827_s20 = scalar_lea.vmem %s1130_s5, 128  ;;  %p1190_p0 = scmp.ne.s32.totalorder %s1185_s13, 0 }
  0x6f   : > { %644 = vmatprep.subr.bf16.mxu1 %v904_v0  ;;  %v654_v23 = vpack.c.bf16 %v341_v22, %v340_v21  ;;  %v657_v26 = vpack.c.bf16 %v343_v25, %v342_v24  ;;  %v344_v27 = vld [vmem:[#allocation8 + $0x60] sm:$0xff]  ;;  %v345_v28 = vld [vmem:[#allocation8 + $0x68] sm:$0xff]  ;;  %v346_v30 = vld [vmem:[#allocation8 + $0x70] sm:$0xff]  ;;  %p828_p11 = scmp.ne.s32.totalorder %s1130_s5, %s827_s20  ;;  %s907_s19 = smov [#allocation9]  }
  0x70   : > { %640 = vmatpush3.bf16.msra.mxu0 %v639_v11  ;;  %v660_v29 = vpack.c.bf16 %v345_v28, %v344_v27  ;;  %v347_v31 = vld [vmem:[#allocation8 + $0x78] sm:$0xff]  ;;  %v242_v36 = vld [vmem:[%s1175_s3] sm:$0xf]  ;;  %s831_s28 = sshll.u32 %s907_s19, 4  ;;  %s832_s28 = int_to_ptr.vmem [resolvable:$false] %s831_s28 }
  0x71   : > { %v663_v32 = vpack.c.bf16 %v347_v31, %v346_v30  ;;  %v251_v37 = vrot.slane %v242_v36, %v250_v35  ;;  %v351_v47 = vrot.slane %v242_v36, %v350_v46  ;;  %v439_v61 = vrot.slane %v242_v36, %v438_v59  ;;  %p829_p1 = pnand %p828_p11, %p1190_p0  ;;  %s833_s11 = scalar_lea.vmem %s832_s28, 256 }
  0x72   : > { %646 = vmatpush3.bf16.msra.mxu1 %v645_v13  ;;  %v444_v63 = vrot.slane %v242_v36, %v443_v60  ;;  %p834_p7 = scmp.lt.s32.totalorder %s1130_s5, %s832_s28  ;;  %p835_p9 = scmp.lt.s32.totalorder %s833_s11, %s827_s20 }
  0x73   : > { %598 = vmatmul.mubr.msk.f32.vlgmr.msra.gmra.mrb[0].mxu0 %vm252_vm1, %v243_v16  ;;  %647 = vmatprep.subr.bf16.mxu1 %v904_v0  ;;  %p830_p3 = pneg %p829_p1 }
  0x74   : > { %p836_p12 = por %p835_p9, %p834_p7 }
  0x76   : > { %649 = vmatpush3.bf16.msra.mxu1 %v648_v17  ;;  %p837_p2 = pnand %p836_p12, %p830_p3 }
  0x77   : > { %650 = vmatprep.subr.bf16.mxu1 %v904_v0 }
  0x7a   : > { %652 = vmatpush3.bf16.msra.mxu1 %v651_v20 }
  0x7b   : > { %653 = vmatprep.subr.bf16.mxu1 %v904_v0 }
  0x7e   : > { %655 = vmatpush3.bf16.msra.mxu1 %v654_v23 }
  0x7f   : > { %656 = vmatprep.subr.bf16.mxu1 %v904_v0 }
  0x82   : > { %658 = vmatpush3.bf16.msra.mxu1 %v657_v26 }
  0x83   : > { %659 = vmatprep.subr.bf16.mxu1 %v904_v0 }
  0x86   : > { %661 = vmatpush3.bf16.msra.mxu1 %v660_v29 }
  0x87   : > { %662 = vmatprep.subr.bf16.mxu1 %v904_v0 }
  0x8a   : > { %664 = vmatpush3.bf16.msra.mxu1 %v663_v32 }
 0x146   : > { %v322_v38 = vpop.f32.mrb[0].mxu0 }
 0x147   : > { %v323_v39 = vadd.f32 %v322_v38, %v251_v37  ;;  %v599_v40 = vpop.f32.mrb[1].mxu0 }
 0x149   : > { %v328_v41 = vmul.f32 0.70710677, %v323_v39  ;;  %v327_v43 = vmul.f32 0.5, %v323_v39 }
 0x14b   : > { %737 = verf.f32 %v328_v41 }
 0x155   : > { %v738_v42 = vpop.eup %737 }
 0x156   : > { %v330_v44 = vadd.f32 1.0, %v738_v42 }
 0x158   : > { %v331_v45 = vmul.f32 %v330_v44, %v327_v43 }
 0x15a   : > { %633 = vmatmul.mubr.f32.vlgmr.msra.gmra.mrb[0].mxu1 %v331_v45 }
 0x22d   : > { %v418_v48 = vpop.f32.mrb[0].mxu1 }
 0x22e   : > { %v419_v49 = vadd.f32 %v418_v48, %v351_v47  ;;  %v634_v50 = vpop.f32.mrb[1].mxu1 }
 0x230   : > { %v423_v51 = vadd.f32 %v419_v49, %v323_v39 }
 0x232   : > { %424 = vadd.xlane.f32.xlu0 %v423_v51 }
 0x2bf   : > { %v425_v52 = vpop.xlane.xlu0 %424 }
 0x2c0   : > { %v427_v53 = vmul.f32 0.0078125, %v425_v52 }
 0x2c2   : > { %v428_v54 = vsub.f32 %v423_v51, %v427_v53 }
 0x2c4   : > { %v429_v55 = vmul.f32 %v428_v54, %v428_v54 }
 0x2c6   : > { %430 = vadd.xlane.f32.xlu0 %v429_v55 }
 0x353   : > { %v431_v56 = vpop.xlane.xlu0 %430 }
 0x354   : > { %v432_v57 = vmul.f32 0.0078125, %v431_v56 }
 0x356   : > { %v433_v58 = vadd.f32 1e-05, %v432_v57 }
 0x358   : > { %739 = vrsqrt.f32 %v433_v58 }
 0x362   : > { %v740_v62 = vpop.eup %739 }
 0x363   : > { %v435_v0 = vmul.f32 %v740_v62, %v428_v54 }
 0x365   : > { %v440_v1 = vmul.f32 %v439_v61, %v435_v0 }
 0x367   : > { %v445_v2 = vadd.f32 %v444_v63, %v440_v1 }
 0x369   : > { %446 = vst [vmem:[%s241_s30] sm:$0xff] %v445_v2 }
 0x36a   : > { %840 = shalt.err (!%p837_p2)
}
 0x36b   : > { %s841_s12 = scalar_lea.hbm %s1128_s10, 128  ;;  %s845_s7 = scalar_lea.hbm %s1176_s4, 256 }
 0x36c   : > { %p842_p13 = scmp.ne.s32.totalorder %s1128_s10, %s841_s12  ;;  %p846_p4 = scmp.lt.u32.totalorder %s1128_s10, %s1176_s4 }
 0x36d   : > { %p847_p5 = scmp.lt.u32.totalorder %s845_s7, %s841_s12  ;;  %p849_p11 = scmp.lt.u32.totalorder %s841_s12, %s1128_s10 }
 0x36e   : > { %p843_p6 = pnand %p842_p13, %p1190_p0 }
 0x36f   : > { %p848_p8 = por %p847_p5, %p846_p4 }
 0x370   : > { %p844_p10 = pneg %p843_p6 }
 0x371   : > { %p850_p1 = por %p849_p11, %p848_p8 }
 0x373   : > { %p851_p3 = pnand %p850_p1, %p844_p10 }
 0x375   : > { %854 = shalt.err (!%p851_p3)
}
 0x376   : > { %675 = dma.vmem_to_hbm [thread:$0]  (%p1190_p0), %s1130_s5, 128, %s1128_s10, %s448_s24  }
 0x377 PF: > { %s473_s23 = sand.u32 1, %s885_s15   ;;  %p1191_p7 = scmp.ne.s32.totalorder %s1181_s22, 0 }
 0x378   : > { %p1192_p9 = scmp.ge.s32.totalorder %s897_s18, 2  ;;  %s474_s27 = scalar_lea.sflag [#allocation5], %s473_s23 }
 0x37a   : > { %p689_p12 = pnand %p1192_p9, %p1191_p7 }
 0x37c   : > { %880 = dma.done.wait (!%p689_p12), %s474_s27, 128  }
 0x37d   : > { %882 = vsyncadd (!%p689_p12), %s474_s27, 4294967168  ;;  %p18_p2 = scmp.ge.s32.totalorder %s1043_s9, 4   ;;  %s1193_s15 = smov %s889_s16 }
 0x37e   : > { %s1194_s16 = smov %s893_s17  ;;  %s1195_s17 = smov %s1059_s14 }
 0x37f   : > { %s1196_s18 = smov %s1043_s9  ;;  %20 = sbr.rel (!%p18_p2) target bundleno = 6 (0x6), region = 89 }
 0x386   :  { %479 = vsyncpa [#allocation4], 1 }
 0x387   :  { %481 = vsyncpa [#allocation4 + $0x1], 1 }
 0x388   :  { %482 = vsyncpa [#allocation7], 1 }
 0x389   :  { %483 = vsyncpa [#allocation5], 1 }
 0x38a   :  { %485 = vsyncpa [#allocation5 + $0x1], 1 }

</bundles_post_ra>
